<compile_context>
chip_gen: v5e
topology: v5e:2x2
jax: 0.10.0
libtpu: 0.0.40
codegen_flags: <defaults>
</compile_context>

<pallas_src>
import functools

import jax
import jax.numpy as jnp
from jax.experimental import pallas as pl
from jax.experimental.pallas import tpu as pltpu


def _round_up(x: int, m: int) -> int:
    return (x + m - 1) // m * m


def _mlp_fused_kernel(*refs, num_layers: int):
    # refs = (x_ref, w0, b0, w1, b1, ..., w_{L-1}, b_{L-1}, o_ref)
    x_ref = refs[0]
    o_ref = refs[-1]

    h = x_ref[...]                                   # bf16 (tm, Kin_p)
    for layer in range(num_layers):
        w_ref = refs[1 + 2 * layer]                  # bf16 (Kin_p, Kout_p)
        b_ref = refs[2 + 2 * layer]                  # f32  (1,  Kout_p)
        y = jnp.dot(h, w_ref[...], preferred_element_type=jnp.float32)
        y = y + b_ref[...]                           # broadcast over rows, f32
        if layer < num_layers - 1:
            h = jnp.maximum(y, 0.0).astype(jnp.bfloat16)
        else:
            o_ref[...] = y.astype(o_ref.dtype)


def mlp_forward_pallas(x, padded_params, num_layers, output_dim, tm_max=512):
    """x: (..., input_dim) f32; padded_params: list of (w_bf16, b_f32) padded
    to 128-lane-dense shapes. Returns (..., output_dim) f32."""
    lead = x.shape[:-1]
    in_dim = x.shape[-1]
    M = 1
    for d in lead:
        M *= d
    x2d = x.reshape(M, in_dim)

    kin_p = padded_params[0][0].shape[0]
    kout_p = padded_params[-1][0].shape[1]

    # Row tiling: large tiles, pad M to a tile multiple (no tail assert,
    # no tiny trailing tiles).  tm is always a multiple of 8 (sublane rule).
    tm = min(tm_max, _round_up(M, 8))
    m_pad = _round_up(M, tm)

    # Pad rows + feature lanes, cast activations to bf16 once.
    x_p = jnp.pad(x2d.astype(jnp.bfloat16),
                  ((0, m_pad - M), (0, kin_p - in_dim)))

    inputs = [x_p]
    in_specs = [pl.BlockSpec((tm, kin_p), lambda i: (i, 0))]
    for w, b in padded_params:
        inputs.append(w)
        in_specs.append(pl.BlockSpec(w.shape, lambda i: (0, 0)))   # VMEM-resident
        inputs.append(b)
        in_specs.append(pl.BlockSpec(b.shape, lambda i: (0, 0)))   # VMEM-resident

    kernel = functools.partial(_mlp_fused_kernel, num_layers=num_layers)
    out = pl.pallas_call(
        kernel,
        out_shape=jax.ShapeDtypeStruct((m_pad, kout_p), jnp.float32),
        grid_spec=pltpu.PrefetchScalarGridSpec(
            num_scalar_prefetch=0,
            grid=(m_pad // tm,),
            in_specs=in_specs,
            out_specs=pl.BlockSpec((tm, kout_p), lambda i: (i, 0)),
        ),
        compiler_params=pltpu.CompilerParams(
            dimension_semantics=("parallel",),
        ),
    )(*inputs)

    return out[:M, :output_dim].reshape(*lead, output_dim)


class MLPPallas:
    """JAX/Pallas equivalent of the PyTorch MLP (stack of Linear + ReLU)."""

    def __init__(self, input_dim, hidden_dim, output_dim, num_layers, key,
                 tm_max=512):
        self.num_layers = num_layers
        self.output_dim = output_dim
        h = [hidden_dim] * (num_layers - 1)
        dims_in = [input_dim] + h
        dims_out = h + [output_dim]

        self.params = []          # unpadded f32 (for reference / export)
        self.padded_params = []   # 128-lane-padded, weights bf16, bias f32
        for n, k in zip(dims_in, dims_out):
            key, wk, bk = jax.random.split(key, 3)
            # nn.Linear default init: uniform +/- 1/sqrt(fan_in).
            bound = 1.0 / (n ** 0.5)
            # PyTorch weight is (out, in); store transposed (in, out) for x @ W.
            w = jax.random.uniform(wk, (n, k), jnp.float32, -bound, bound)
            b = jax.random.uniform(bk, (1, k), jnp.float32, -bound, bound)
            self.params.append((w, b))

            n_p = max(128, _round_up(n, 128))
            k_p = max(128, _round_up(k, 128))
            w_p = jnp.zeros((n_p, k_p), jnp.bfloat16).at[:n, :k].set(
                w.astype(jnp.bfloat16))
            b_p = jnp.zeros((1, k_p), jnp.float32).at[:, :k].set(b)
            self.padded_params.append((w_p, b_p))

        # Jit the whole forward so pad/cast/slice fuse with the kernel launch.
        self._fwd = jax.jit(functools.partial(
            mlp_forward_pallas,
            num_layers=num_layers,
            output_dim=output_dim,
            tm_max=tm_max,
        ))

    def __call__(self, x):
        return self._fwd(x, self.padded_params)


def _reference(x, params, num_layers):
    # Pure-JAX f32 reference of the same forward pass.
    lead = x.shape[:-1]
    y = x.reshape(-1, x.shape[-1])
    for i, (w, b) in enumerate(params):
        y = y @ w + b
        if i < num_layers - 1:
            y = jnp.maximum(y, 0.0)
    return y.reshape(*lead, y.shape[-1])


if __name__ == "__main__":
    key = jax.random.PRNGKey(0)
    key, xkey, xkey2, pkey = jax.random.split(key, 4)

    # Shapes consistent with the bbox-head MLP in DAB-Deformable-DETR:
    # (batch, num_queries, input_dim).
    input_dim, hidden_dim, output_dim, num_layers = 32, 64, 16, 3
    mlp = MLPPallas(input_dim, hidden_dim, output_dim, num_layers, pkey)

    # Small case: single row tile.
    x = jax.random.normal(xkey, (2, 8, input_dim), jnp.float32)
    out = jax.block_until_ready(mlp(x))
    ref = _reference(x, mlp.params, num_layers)
    assert out.shape == (2, 8, output_dim)
    assert jnp.allclose(out, ref, atol=2e-2, rtol=2e-2), "mismatch (small case)"

    # Realistic case: M = 2 * 300 = 600 rows -> padded/tiled row grid.
    x_big = jax.random.normal(xkey2, (2, 300, input_dim), jnp.float32)
    out_big = jax.block_until_ready(mlp(x_big))
    ref_big = _reference(x_big, mlp.params, num_layers)
    assert out_big.shape == (2, 300, output_dim)
    assert jnp.allclose(out_big, ref_big, atol=2e-2, rtol=2e-2), "mismatch (big case)"

    print("KERNEL_OK")
</pallas_src>

<mosaic_0001>
module attributes {stable_mosaic.version = 11 : i64} {
  func.func @_mlp_fused_kernel(%arg0: i32, %arg1: memref<16x128xbf16, #tpu.memory_space<vmem>>, %arg2: memref<128x128xbf16, #tpu.memory_space<vmem>>, %arg3: memref<1x128xf32, #tpu.memory_space<vmem>>, %arg4: memref<128x128xbf16, #tpu.memory_space<vmem>>, %arg5: memref<1x128xf32, #tpu.memory_space<vmem>>, %arg6: memref<128x128xbf16, #tpu.memory_space<vmem>>, %arg7: memref<1x128xf32, #tpu.memory_space<vmem>>, %arg8: memref<16x128xf32, #tpu.memory_space<vmem>>) attributes {dimension_semantics = [#tpu.dimension_semantics<parallel>], iteration_bounds = array<i64: 1>, scalar_prefetch = 0 : i64, scratch_operands = 0 : i64, tpu.core_type = #tpu.core_type<tc>, window_params = [{transform_indices = @transform_0, window_bounds = array<i64: 16, 128>}, {pipeline_mode = #tpu.pipeline_mode<synchronous>, transform_indices = @transform_1, window_bounds = array<i64: 128, 128>}, {pipeline_mode = #tpu.pipeline_mode<synchronous>, transform_indices = @transform_2, window_bounds = array<i64: 1, 128>}, {pipeline_mode = #tpu.pipeline_mode<synchronous>, transform_indices = @transform_3, window_bounds = array<i64: 128, 128>}, {pipeline_mode = #tpu.pipeline_mode<synchronous>, transform_indices = @transform_4, window_bounds = array<i64: 1, 128>}, {pipeline_mode = #tpu.pipeline_mode<synchronous>, transform_indices = @transform_5, window_bounds = array<i64: 128, 128>}, {pipeline_mode = #tpu.pipeline_mode<synchronous>, transform_indices = @transform_6, window_bounds = array<i64: 1, 128>}, {transform_indices = @transform_7, window_bounds = array<i64: 16, 128>}]} {
    %c0 = arith.constant 0 : index
    %c0_0 = arith.constant 0 : index
    %0 = vector.load %arg1[%c0, %c0_0] : memref<16x128xbf16, #tpu.memory_space<vmem>>, vector<16x128xbf16>
    %c0_1 = arith.constant 0 : index
    %c0_2 = arith.constant 0 : index
    %1 = vector.load %arg2[%c0_1, %c0_2] : memref<128x128xbf16, #tpu.memory_space<vmem>>, vector<128x128xbf16>
    %cst = arith.constant dense<0.000000e+00> : vector<16x128xf32>
    %2 = tpu.matmul %0, %1, %cst {dimension_numbers = #tpu.dot_dimension_numbers<[1], [0], [0], [1], [0, 0, 1, 1], [], []>} : vector<16x128xbf16>, vector<128x128xbf16>, vector<16x128xf32> -> vector<16x128xf32>
    %c0_3 = arith.constant 0 : index
    %c0_4 = arith.constant 0 : index
    %3 = vector.load %arg3[%c0_3, %c0_4] : memref<1x128xf32, #tpu.memory_space<vmem>>, vector<1x128xf32>
    %4 = vector.broadcast %3 : vector<1x128xf32> to vector<16x128xf32>
    %5 = arith.addf %2, %4 : vector<16x128xf32>
    %cst_5 = arith.constant 0.000000e+00 : f32
    %6 = vector.broadcast %cst_5 : f32 to vector<16x128xf32>
    %7 = arith.maximumf %5, %6 : vector<16x128xf32>
    %8 = arith.truncf %7 : vector<16x128xf32> to vector<16x128xbf16>
    %c0_6 = arith.constant 0 : index
    %c0_7 = arith.constant 0 : index
    %9 = vector.load %arg4[%c0_6, %c0_7] : memref<128x128xbf16, #tpu.memory_space<vmem>>, vector<128x128xbf16>
    %cst_8 = arith.constant dense<0.000000e+00> : vector<16x128xf32>
    %10 = tpu.matmul %8, %9, %cst_8 {dimension_numbers = #tpu.dot_dimension_numbers<[1], [0], [0], [1], [0, 0, 1, 1], [], []>} : vector<16x128xbf16>, vector<128x128xbf16>, vector<16x128xf32> -> vector<16x128xf32>
    %c0_9 = arith.constant 0 : index
    %c0_10 = arith.constant 0 : index
    %11 = vector.load %arg5[%c0_9, %c0_10] : memref<1x128xf32, #tpu.memory_space<vmem>>, vector<1x128xf32>
    %12 = vector.broadcast %11 : vector<1x128xf32> to vector<16x128xf32>
    %13 = arith.addf %10, %12 : vector<16x128xf32>
    %cst_11 = arith.constant 0.000000e+00 : f32
    %14 = vector.broadcast %cst_11 : f32 to vector<16x128xf32>
    %15 = arith.maximumf %13, %14 : vector<16x128xf32>
    %16 = arith.truncf %15 : vector<16x128xf32> to vector<16x128xbf16>
    %c0_12 = arith.constant 0 : index
    %c0_13 = arith.constant 0 : index
    %17 = vector.load %arg6[%c0_12, %c0_13] : memref<128x128xbf16, #tpu.memory_space<vmem>>, vector<128x128xbf16>
    %cst_14 = arith.constant dense<0.000000e+00> : vector<16x128xf32>
    %18 = tpu.matmul %16, %17, %cst_14 {dimension_numbers = #tpu.dot_dimension_numbers<[1], [0], [0], [1], [0, 0, 1, 1], [], []>} : vector<16x128xbf16>, vector<128x128xbf16>, vector<16x128xf32> -> vector<16x128xf32>
    %c0_15 = arith.constant 0 : index
    %c0_16 = arith.constant 0 : index
    %19 = vector.load %arg7[%c0_15, %c0_16] : memref<1x128xf32, #tpu.memory_space<vmem>>, vector<1x128xf32>
    %20 = vector.broadcast %19 : vector<1x128xf32> to vector<16x128xf32>
    %21 = arith.addf %18, %20 : vector<16x128xf32>
    %c0_17 = arith.constant 0 : index
    %c0_18 = arith.constant 0 : index
    %22 = vector.load %arg8[%c0_17, %c0_18] : memref<16x128xf32, #tpu.memory_space<vmem>>, vector<16x128xf32>
    tpu.vector_store %arg8[%c0_17, %c0_18], %21 {strides = array<i32>} : memref<16x128xf32, #tpu.memory_space<vmem>>, vector<16x128xf32>,
    return
  }
  func.func @transform_0(%arg0: i32) -> (i32, i32) {
    %c0_i32 = arith.constant 0 : i32
    %c0_i32_0 = arith.constant 0 : i32
    return %arg0, %c0_i32 : i32, i32
  }
  func.func @transform_1(%arg0: i32) -> (i32, i32) {
    %c0_i32 = arith.constant 0 : i32
    %c0_i32_0 = arith.constant 0 : i32
    %c0_i32_1 = arith.constant 0 : i32
    return %c0_i32, %c0_i32_0 : i32, i32
  }
  func.func @transform_2(%arg0: i32) -> (i32, i32) {
    %c0_i32 = arith.constant 0 : i32
    %c0_i32_0 = arith.constant 0 : i32
    %c0_i32_1 = arith.constant 0 : i32
    return %c0_i32, %c0_i32_0 : i32, i32
  }
  func.func @transform_3(%arg0: i32) -> (i32, i32) {
    %c0_i32 = arith.constant 0 : i32
    %c0_i32_0 = arith.constant 0 : i32
    %c0_i32_1 = arith.constant 0 : i32
    return %c0_i32, %c0_i32_0 : i32, i32
  }
  func.func @transform_4(%arg0: i32) -> (i32, i32) {
    %c0_i32 = arith.constant 0 : i32
    %c0_i32_0 = arith.constant 0 : i32
    %c0_i32_1 = arith.constant 0 : i32
    return %c0_i32, %c0_i32_0 : i32, i32
  }
  func.func @transform_5(%arg0: i32) -> (i32, i32) {
    %c0_i32 = arith.constant 0 : i32
    %c0_i32_0 = arith.constant 0 : i32
    %c0_i32_1 = arith.constant 0 : i32
    return %c0_i32, %c0_i32_0 : i32, i32
  }
  func.func @transform_6(%arg0: i32) -> (i32, i32) {
    %c0_i32 = arith.constant 0 : i32
    %c0_i32_0 = arith.constant 0 : i32
    %c0_i32_1 = arith.constant 0 : i32
    return %c0_i32, %c0_i32_0 : i32, i32
  }
  func.func @transform_7(%arg0: i32) -> (i32, i32) {
    %c0_i32 = arith.constant 0 : i32
    %c0_i32_0 = arith.constant 0 : i32
    return %arg0, %c0_i32 : i32, i32
  }
}

</mosaic_0001>

<bundles_post_ra>
// kernel: mlp_forward_pallas.1
= control target key start
LH: loop header
LB: loop body
LE: loop exit
PB: predicated region body
PF: predicated region fallthrough
CT: control target
= control target key end

     0   :  { %12 = vsyncpa [#allocation3], 0  ;;  %s622_s0 = inlined_call_operand.vmem [shape: bf16[16,128], index: 0, kind: input, shape index: {}]   ;;  %s623_s1 = inlined_call_operand.hbm [shape: bf16[128,128], index: 1, kind: input, shape index: {}]   ;;  %s624_s2 = inlined_call_operand.vmem [shape: f32[1,128], index: 2, kind: input, shape index: {}]   ;;  %s625_s3 = inlined_call_operand.hbm [shape: bf16[128,128], index: 3, kind: input, shape index: {}]   ;;  %s626_s4 = inlined_call_operand.vmem [shape: f32[1,128], index: 4, kind: input, shape index: {}]   ;;  %s627_s5 = inlined_call_operand.hbm [shape: bf16[128,128], index: 5, kind: input, shape index: {}]   ;;  %s628_s6 = inlined_call_operand.vmem [shape: f32[1,128], index: 6, kind: input, shape index: {}]   ;;  %s629_s7 = inlined_call_operand.vmem [shape: f32[16,128], index: 7, kind: output, shape index: {}]  }
   0x1   :  { %13 = vsyncpa [#allocation5], 0  ;;  %s35_s26 = sshll.u32 %s625_s3, 4  ;;  %s550_s27 = smov [#allocation4]   ;;  %s36_s26 = int_to_ptr.hbm [resolvable:$true] %s35_s26 }
   0x2   :  { %s37_s28 = sshll.u32 %s550_s27, 4  ;;  %s20_s8 = sshll.u32 %s623_s1, 4  ;;  %s38_s28 = int_to_ptr.vmem [resolvable:$true] %s37_s28  ;;  %s21_s8 = int_to_ptr.hbm [resolvable:$true] %s20_s8 }
   0x3   :  { %s551_s9 = smov 64   ;;  %s552_s10 = smov 4  }
   0x4   :  { %43 = dma.hbm_to_vmem [thread:$0]  %s36_s26, 1024, %s38_s28, [#allocation5], %s551_s9, %s551_s9, %s552_s10  }
   0x5   :  { %s553_s11 = smov [#allocation2]   ;;  %s50_s15 = sshll.u32 %s627_s5, 4  ;;  %s51_s15 = int_to_ptr.hbm [resolvable:$true] %s50_s15 }
   0x6   :  { %s22_s12 = sshll.u32 %s553_s11, 4  ;;  %s554_s3 = smov [#allocation6]   ;;  %s23_s12 = int_to_ptr.vmem [resolvable:$true] %s22_s12 }
   0x7   :  { %28 = dma.hbm_to_vmem [thread:$0]  %s21_s8, 1024, %s23_s12, [#allocation3], %s551_s9, %s551_s9, %s552_s10  }
   0x8   :  { %s52_s16 = sshll.u32 %s554_s3, 4  ;;  %s53_s16 = int_to_ptr.vmem [resolvable:$true] %s52_s16 }
   0x9   :  { %58 = dma.hbm_to_vmem [thread:$0]  %s51_s15, 1024, %s53_s16, [#allocation5], %s551_s9, %s551_s9, %s552_s10  }
   0xa   :  { %546 = dma.done.wait [#allocation3], 1024  }
   0xb   :  { %547 = vsyncadd [#allocation3], 4294966272 }
   0xc   :  { %548 = dma.done.wait [#allocation5], 2048  }
   0xd   :  { %549 = vsyncadd [#allocation5], 4294965248  ;;  %v449_v0 = vld [vmem:[#allocation2 + $0x38] sm:$0xff]  ;;  %v448_v1 = vld [vmem:[#allocation2 + $0x30] sm:$0xff] }
   0xe   :  { %149 = vmatpush.bf16.msra.mxu0 %v449_v0  ;;  %v457_v2 = vld [vmem:[#allocation4 + $0x38] sm:$0xff]  ;;  %v456_v3 = vld [vmem:[#allocation4 + $0x30] sm:$0xff]  ;;  %v447_v4 = vld [vmem:[#allocation2 + $0x28] sm:$0xff] }
   0xf   :  { %234 = vmatpush.bf16.msra.mxu1 %v457_v2  ;;  %v455_v5 = vld [vmem:[#allocation4 + $0x28] sm:$0xff]  ;;  %v446_v6 = vld [vmem:[#allocation2 + $0x20] sm:$0xff]  ;;  %v445_v8 = vld [vmem:[#allocation2 + $0x18] sm:$0xff] }
  0x10   :  { %v454_v7 = vld [vmem:[#allocation4 + $0x20] sm:$0xff]  ;;  %v444_v9 = vld [vmem:[#allocation2 + $0x10] sm:$0xff]  ;;  %v443_v10 = vld [vmem:[#allocation2 + $0x8] sm:$0xff] }
  0x11   :  { %v442_v11 = vld [vmem:[#allocation2] sm:$0xff]  ;;  %v453_v13 = vld [vmem:[#allocation4 + $0x18] sm:$0xff]  ;;  %v452_v14 = vld [vmem:[#allocation4 + $0x10] sm:$0xff] }
  0x12   :  { %150 = vmatpush.bf16.msra.mxu0 %v448_v1  ;;  %v441_v12 = vld [vmem:[%s622_s0] sm:$0xff]  ;;  %v451_v15 = vld [vmem:[#allocation4 + $0x8] sm:$0xff]  ;;  %v465_v17 = vld [vmem:[#allocation6 + $0x38] sm:$0xff] }
  0x13   :  { %235 = vmatpush.bf16.msra.mxu1 %v456_v3  ;;  %v450_v16 = vld [vmem:[#allocation4] sm:$0xff]  ;;  %319 = vmatpush.bf16.msra.mxu2 %v465_v17  ;;  %v464_v18 = vld [vmem:[#allocation6 + $0x30] sm:$0xff]  ;;  %v463_v19 = vld [vmem:[#allocation6 + $0x28] sm:$0xff] }
  0x14   :  { %v462_v20 = vld [vmem:[#allocation6 + $0x20] sm:$0xff]  ;;  %v461_v29 = vld [vmem:[#allocation6 + $0x18] sm:$0xff]  ;;  %v460_v30 = vld [vmem:[#allocation6 + $0x10] sm:$0xff] }
  0x15   :  { %v471_v22 = vld [vmem:[%s624_s2] ss:$0 sm:$0xff]  ;;  %v459_v31 = vld [vmem:[#allocation6 + $0x8] sm:$0xff] }
  0x16   :  { %151 = vmatpush.bf16.msra.mxu0 %v447_v4  ;;  %v458_v32 = vld [vmem:[#allocation6] sm:$0xff] }
  0x17   :  { %236 = vmatpush.bf16.msra.mxu1 %v455_v5  ;;  %320 = vmatpush.bf16.msra.mxu2 %v464_v18  ;;  %v472_v34 = vld [vmem:[%s626_s4] ss:$0 sm:$0xff] }
  0x18   :  { %v473_v41 = vld [vmem:[%s628_s6] ss:$0 sm:$0xff] }
  0x1a   :  { %152 = vmatpush.bf16.msra.mxu0 %v446_v6 }
  0x1b   :  { %237 = vmatpush.bf16.msra.mxu1 %v454_v7  ;;  %321 = vmatpush.bf16.msra.mxu2 %v463_v19 }
  0x1e   :  { %153 = vmatpush.bf16.msra.mxu0 %v445_v8 }
  0x1f   :  { %238 = vmatpush.bf16.msra.mxu1 %v453_v13  ;;  %322 = vmatpush.bf16.msra.mxu2 %v462_v20 }
  0x22   :  { %154 = vmatpush.bf16.msra.mxu0 %v444_v9 }
  0x23   :  { %239 = vmatpush.bf16.msra.mxu1 %v452_v14  ;;  %323 = vmatpush.bf16.msra.mxu2 %v461_v29 }
  0x26   :  { %155 = vmatpush.bf16.msra.mxu0 %v443_v10 }
  0x27   :  { %240 = vmatpush.bf16.msra.mxu1 %v451_v15  ;;  %324 = vmatpush.bf16.msra.mxu2 %v460_v30 }
  0x2a   :  { %156 = vmatpush.bf16.msra.mxu0 %v442_v11 }
  0x2b   :  { %241 = vmatpush.bf16.msra.mxu1 %v450_v16  ;;  %325 = vmatpush.bf16.msra.mxu2 %v459_v31 }
  0x2d   :  { %157 = vmatmul.bf16.vlgmr.msra.gmra.mxu0 %v441_v12 }
  0x2f   :  { %326 = vmatpush.bf16.msra.mxu2 %v458_v32 }
  0xaa   :  { %v158_v21 = vpop.f32.mrf.mxu0 }
  0xab   :  { %v159_v23 = vadd.f32 %v471_v22, %v158_v21 }
  0xad   :  { %v163_v26 = vmax.f32 %v159_v23, 0.0 }
  0xb2   :  { %v160_v24 = vpop.f32.mrf.mxu0 }
  0xb3   :  { %v161_v25 = vadd.f32 %v471_v22, %v160_v24 }
  0xb5   :  { %v164_v27 = vmax.f32 %v161_v25, 0.0 }
  0xb7   :  { %v165_v28 = vpack.c.bf16 %v164_v27, %v163_v26 }
  0xb9   :  { %242 = vmatmul.bf16.vlgmr.msra.gmra.mxu1 %v165_v28 }
 0x136   :  { %v243_v33 = vpop.f32.mrf.mxu1 }
 0x137   :  { %v244_v35 = vadd.f32 %v472_v34, %v243_v33 }
 0x139   :  { %v248_v38 = vmax.f32 %v244_v35, 0.0 }
 0x13e   :  { %v245_v36 = vpop.f32.mrf.mxu1 }
 0x13f   :  { %v246_v37 = vadd.f32 %v472_v34, %v245_v36 }
 0x141   :  { %v249_v39 = vmax.f32 %v246_v37, 0.0 }
 0x143   :  { %v250_v40 = vpack.c.bf16 %v249_v39, %v248_v38 }
 0x145   :  { %327 = vmatmul.bf16.vlgmr.msra.gmra.mxu2 %v250_v40 }
 0x1c8   :  { %v328_v42 = vpop.f32.mrf.mxu2 }
 0x1c9   :  { %v329_v43 = vadd.f32 %v473_v41, %v328_v42 }
 0x1cb   :  { %333 = vst [vmem:[%s629_s7] sm:$0xff] %v329_v43 }
 0x1d0   :  { %v330_v44 = vpop.f32.mrf.mxu2 }
 0x1d1   :  { %v331_v45 = vadd.f32 %v473_v41, %v330_v44 }
 0x1d3   :  { %334 = vst [vmem:[%s629_s7 + $0x8] sm:$0xff] %v331_v45 }
 0x1d4   :  { %339 = vsyncpa [#allocation3], 1 }
 0x1d5   :  { %340 = vsyncpa [#allocation5], 1 }

</bundles_post_ra>
